<compile_context>
chip_gen: v5e
topology: v5e:2x2
jax: 0.10.0
libtpu: 0.0.40
codegen_flags: <defaults>
</compile_context>

<pallas_src>
import math
from functools import partial

import jax
import jax.numpy as jnp
from jax import lax
from jax.experimental import pallas as pl
from jax.experimental.pallas import tpu as pltpu


def _round_up(x, m):
    return (x + m - 1) // m * m


def _posemb_kernel(x_ref, w_ref, o_ref, *, half_dim):
    # x_ref: (TB, 1) f32 timesteps
    # w_ref: (1, P)  f32 padded weights laid out as [0 | w*2pi | w*2pi | 0...]
    # o_ref: (TB, P) output block; row layout: lane 0 = x, lanes [1, 1+H) = sin,
    #        lanes [1+H, 1+2H) = cos, tail lanes are don't-care (sliced off by
    #        the wrapper), so no zero-fill store is needed.
    x = x_ref[...]                                     # (TB, 1)
    theta = x * w_ref[...]                             # (TB, P) broadcast VPU mul
    s = jnp.sin(theta)                                 # EUP
    c = jnp.cos(theta)                                 # EUP
    lane = lax.broadcasted_iota(jnp.int32, theta.shape, 1)
    # lane 0 -> pass-through x, lanes 1..H -> sin, lanes H+1.. -> cos.
    out = jnp.where(lane == 0, x, jnp.where(lane <= half_dim, s, c))
    o_ref[...] = out.astype(o_ref.dtype)               # single unmasked full-width store


def random_or_learned_sinusoidal_pos_emb(x, weights, *, block_b=512,
                                         vmem_block_bytes=4 * 1024 * 1024,
                                         out_dtype=jnp.float32):
    """Forward of RandomOrLearnedSinusoidalPosEmb.

    x: (B,) scalar timesteps; weights: (half_dim,) parameter.
    Returns (B, 2*half_dim + 1) = concat([x, sin(freqs), cos(freqs)], -1),
    matching the PyTorch module.
    """
    assert x.ndim == 1 and weights.ndim == 1
    b = x.shape[0]
    half_dim = weights.shape[0]
    dim = 2 * half_dim

    # Lane-dense kernel output: full [x | sin | cos] row padded to a multiple of 128.
    p = _round_up(dim + 1, 128)

    # Fold 2*pi into the weights once and duplicate them for the sin and cos
    # halves, at lane offsets 1 and 1+H (lane 0 stays 0 -> x column).
    w_scaled = weights.astype(jnp.float32) * (2.0 * math.pi)
    w_row = jnp.zeros((1, p), jnp.float32)
    w_row = w_row.at[0, 1:1 + half_dim].set(w_scaled)
    w_row = w_row.at[0, 1 + half_dim:1 + dim].set(w_scaled)

    # Batch tile: multiple of 8 (sublane), bounded by the VMEM budget for the
    # double-buffered f32 output block, and capped at ceil(b/2) so the grid has
    # >= 2 programs whenever possible (v7x megacore sharding).
    max_tb_vmem = max(8, (vmem_block_bytes // (2 * p * 4)) // 8 * 8)
    tb = max(8, min(block_b, max_tb_vmem) // 8 * 8)
    tb = min(tb, max(8, _round_up(-(-b // 2), 8)))
    b_pad = _round_up(b, tb)

    x_f32 = x.astype(jnp.float32)
    x2d = jnp.zeros((b_pad, 1), jnp.float32).at[:b, 0].set(x_f32)

    out_padded = pl.pallas_call(
        partial(_posemb_kernel, half_dim=half_dim),
        out_shape=jax.ShapeDtypeStruct((b_pad, p), out_dtype),
        grid_spec=pltpu.PrefetchScalarGridSpec(
            num_scalar_prefetch=0,
            grid=(b_pad // tb,),
            in_specs=[
                pl.BlockSpec((tb, 1), lambda i: (i, 0)),
                # Same block every grid step -> weights fetched once, stay in VMEM.
                pl.BlockSpec((1, p), lambda i: (0, 0)),
            ],
            out_specs=pl.BlockSpec((tb, p), lambda i: (i, 0)),
        ),
        compiler_params=pltpu.CompilerParams(
            dimension_semantics=("parallel",)),
    )(x2d, w_row)

    # Only the final slice remains wrapper-side (no concatenate / re-pack).
    return out_padded[:b, :dim + 1]


def reference(x, weights):
    x2 = x.reshape(-1, 1).astype(jnp.float32)
    freqs = x2 * weights.reshape(1, -1).astype(jnp.float32) * 2.0 * math.pi
    return jnp.concatenate([x2, jnp.sin(freqs), jnp.cos(freqs)], axis=-1)


if __name__ == "__main__":
    dim = 32            # module asserts dim % 2 == 0
    half_dim = dim // 2
    batch = 8

    key = jax.random.PRNGKey(0)
    k_x, k_w = jax.random.split(key)
    # Mirrors nn.Parameter(torch.randn(half_dim)) deterministically.
    weights = jax.random.normal(k_w, (half_dim,), dtype=jnp.float32)
    # Example scalar timesteps.
    x = jax.random.uniform(k_x, (batch,), dtype=jnp.float32) * 10.0

    out = random_or_learned_sinusoidal_pos_emb(x, weights)
    out = jax.block_until_ready(out)

    ref = reference(x, weights)
    assert out.shape == (batch, dim + 1), out.shape
    # 2*pi is pre-folded into the weights in the kernel path, so the sin/cos
    # argument differs from the reference by ~1 ulp (args up to ~2e2 here),
    # hence the slightly relaxed tolerance.
    assert jnp.allclose(out, ref, atol=1e-4, rtol=1e-4), float(
        jnp.max(jnp.abs(out - ref))
    )
    print("KERNEL_OK")
</pallas_src>

<mosaic_0001>
module attributes {stable_mosaic.version = 11 : i64} {
  func.func @_posemb_kernel(%arg0: i32, %arg1: memref<8x1xf32, #tpu.memory_space<vmem>>, %arg2: memref<1x128xf32, #tpu.memory_space<vmem>>, %arg3: memref<8x128xf32, #tpu.memory_space<vmem>>) attributes {dimension_semantics = [#tpu.dimension_semantics<parallel>], iteration_bounds = array<i64: 1>, scalar_prefetch = 0 : i64, scratch_operands = 0 : i64, tpu.core_type = #tpu.core_type<tc>, window_params = [{transform_indices = @transform_0, window_bounds = array<i64: 8, 1>}, {pipeline_mode = #tpu.pipeline_mode<synchronous>, transform_indices = @transform_1, window_bounds = array<i64: 1, 128>}, {transform_indices = @transform_2, window_bounds = array<i64: 8, 128>}]} {
    %c0 = arith.constant 0 : index
    %c0_0 = arith.constant 0 : index
    %0 = vector.load %arg1[%c0, %c0_0] : memref<8x1xf32, #tpu.memory_space<vmem>>, vector<8x1xf32>
    %c0_1 = arith.constant 0 : index
    %c0_2 = arith.constant 0 : index
    %1 = vector.load %arg2[%c0_1, %c0_2] : memref<1x128xf32, #tpu.memory_space<vmem>>, vector<1x128xf32>
    %2 = vector.broadcast %0 : vector<8x1xf32> to vector<8x128xf32>
    %3 = vector.broadcast %1 : vector<1x128xf32> to vector<8x128xf32>
    %4 = arith.mulf %2, %3 : vector<8x128xf32>
    %5 = math.sin %4 : vector<8x128xf32>
    %6 = math.cos %4 : vector<8x128xf32>
    %7 = tpu.iota {dimensions = array<i32: 1>} : vector<8x128xi32>
    %c0_i32 = arith.constant 0 : i32
    %8 = vector.broadcast %c0_i32 : i32 to vector<8x128xi32>
    %9 = arith.cmpi eq, %7, %8 : vector<8x128xi32>
    %c16_i32 = arith.constant 16 : i32
    %10 = vector.broadcast %c16_i32 : i32 to vector<8x128xi32>
    %11 = arith.cmpi sle, %7, %10 : vector<8x128xi32>
    %12 = arith.select %11, %5, %6 : vector<8x128xi1>, vector<8x128xf32>
    %13 = vector.shape_cast %0 : vector<8x1xf32> to vector<8x1xf32>
    %14 = vector.broadcast %13 : vector<8x1xf32> to vector<8x128xf32>
    %15 = arith.select %9, %14, %12 : vector<8x128xi1>, vector<8x128xf32>
    %c0_3 = arith.constant 0 : index
    %c0_4 = arith.constant 0 : index
    %16 = vector.load %arg3[%c0_3, %c0_4] : memref<8x128xf32, #tpu.memory_space<vmem>>, vector<8x128xf32>
    tpu.vector_store %arg3[%c0_3, %c0_4], %15 {strides = array<i32>} : memref<8x128xf32, #tpu.memory_space<vmem>>, vector<8x128xf32>,
    return
  }
  func.func @transform_0(%arg0: i32) -> (i32, i32) {
    %c0_i32 = arith.constant 0 : i32
    %c0_i32_0 = arith.constant 0 : i32
    return %arg0, %c0_i32 : i32, i32
  }
  func.func @transform_1(%arg0: i32) -> (i32, i32) {
    %c0_i32 = arith.constant 0 : i32
    %c0_i32_0 = arith.constant 0 : i32
    %c0_i32_1 = arith.constant 0 : i32
    return %c0_i32, %c0_i32_0 : i32, i32
  }
  func.func @transform_2(%arg0: i32) -> (i32, i32) {
    %c0_i32 = arith.constant 0 : i32
    %c0_i32_0 = arith.constant 0 : i32
    return %arg0, %c0_i32 : i32, i32
  }
}

</mosaic_0001>

<bundles_post_ra>
// kernel: tpu_custom_call.1
= control target key start
LH: loop header
LB: loop body
LE: loop exit
PB: predicated region body
PF: predicated region fallthrough
CT: control target
= control target key end

     0   :  { %v397_v1 = vmov 0   ;;  %s496_s0 = inlined_call_operand.vmem [shape: f32[8,1], index: 0, kind: input, shape index: {}]   ;;  %s497_s1 = inlined_call_operand.vmem [shape: f32[1,128], index: 1, kind: input, shape index: {}]   ;;  %s498_s2 = inlined_call_operand.hbm [shape: f32[8,128], index: 2, kind: output, shape index: {}]  }
   0x1   :  { %v12_v0 = vld [vmem:[%s496_s0] sm:$0xff]  ;;  %369 = vset.pattern.permute.xlu0 %v397_v1 }
   0x2   :  { %16 = vperm.xlu0 %369, %v12_v0  }
   0x3   :  { %7 = vsyncpa [#allocation3], 0  ;;  %v370_v2 = vld [vmem:[%s497_s1] ss:$0 sm:$0xff]  ;;  %v398_v16 = vmov 683565275  }
   0x4   :  { %v399_v18 = vmov 2475754826   ;;  %v400_v21 = vmov 2131351028   ;;  %v401_v24 = vmov 2102212464  }
   0x5   :  { %v402_v27 = vmov 920167782   ;;  %v403_v30 = vmov 1326507024   ;;  %s404_s0 = smov [#allocation2]   ;;  %s346_s15 = sshll.u32 %s498_s2, 4  ;;  %s347_s15 = int_to_ptr.hbm [resolvable:$true] %s346_s15 }
   0x6   :  { %s344_s1 = sshll.u32 %s404_s0, 4  ;;  %s345_s1 = int_to_ptr.vmem [resolvable:$true] %s344_s1 }
  0x74   :  { %v427_v3 = vpop.permute.xlu0 %16 }
  0x75   :  { %v430_v4 = vmul.f32 %v370_v2, %v427_v3 }
  0x77   :  { %v26_v5 = vand.u32 2139095040, %v430_v4  ;;  %v23_v8 = vand.u32 2147483647, %v430_v4  ;;  %vm25_vm12 = vcmp.lt.s32.totalorder %v430_v4, 0 }
  0x79   :  { %v27_v6 = vshrl.u32 %v26_v5, 23  ;;  %v30_v10 = vand.u32 8388607, %v23_v8  ;;  %vm24_vm13 = vcmp.le.f32.partialorder %v23_v8, 0.7853982 }
  0x7b   :  { %v355_v7 = vadd.s32 4294967169, %v27_v6  ;;  %v31_v14 = vor.u32 8388608, %v30_v10 }
  0x7d   :  { %v33_v9 = vadd.s32 1, %v355_v7  ;;  %v447_v37 = vshll.u32 %v31_v14, 8 }
  0x7f   :  { %vm34_vm0 = vcmp.gt.s32.totalorder %v33_v9, 0  ;;  %v72_v46 = vand.u32 65535, %v447_v37  ;;  %v73_v47 = vshrl.u32 %v447_v37, 16 }
  0x80   :  { %v35_v11 = vsel %vm34_vm0, %v33_v9, 0 }
  0x81   :  { %v37_v12 = vand.u32 31, %v35_v11  ;;  %v438_v15 = vshrl.u32 %v35_v11, 5 }
  0x83   :  { %v436_v13 = vsub.s32 32, %v37_v12  ;;  %v40_v17 = vshll.u32 %v398_v16, %v37_v12  ;;  %v43_v19 = vshll.u32 %v399_v18, %v37_v12  ;;  %v46_v23 = vshll.u32 %v400_v21, %v37_v12 }
  0x84   :  { %v49_v26 = vshll.u32 %v401_v24, %v37_v12  ;;  %v52_v29 = vshll.u32 %v402_v27, %v37_v12  ;;  %vm55_vm1 = vcmp.lt.s32.totalorder %v438_v15, 1  ;;  %vm58_vm2 = vcmp.lt.s32.totalorder %v438_v15, 4 }
  0x85   :  { %v41_v20 = vshrl.u32 %v399_v18, %v436_v13  ;;  %v44_v22 = vshrl.u32 %v400_v21, %v436_v13  ;;  %v47_v25 = vshrl.u32 %v401_v24, %v436_v13  ;;  %v50_v28 = vshrl.u32 %v402_v27, %v436_v13 }
  0x86   :  { %v53_v31 = vshrl.u32 %v403_v30, %v436_v13  ;;  %vm57_vm3 = vcmp.lt.s32.totalorder %v438_v15, 3  ;;  %vm56_vm4 = vcmp.lt.s32.totalorder %v438_v15, 2  ;;  %v39_v12 = vshrl.u32 %v398_v16, %v436_v13 }
  0x87   :  { %v42_v32 = vor.u32 %v41_v20, %v40_v17  ;;  %v45_v33 = vor.u32 %v44_v22, %v43_v19  ;;  %v48_v34 = vor.u32 %v47_v25, %v46_v23  ;;  %v51_v35 = vor.u32 %v50_v28, %v49_v26 }
  0x88   :  { %v54_v36 = vor.u32 %v53_v31, %v52_v29 }
  0x89   :  { %v63_v38 = vsel %vm55_vm1, %v42_v32, %v45_v33  ;;  %v67_v39 = vsel %vm55_vm1, %v45_v33, %v48_v34  ;;  %v64_v40 = vsel %vm58_vm2, %v51_v35, 920167782  ;;  %v60_v9 = vsel %vm58_vm2, %v48_v34, 2102212464 }
  0x8a   :  { %v68_v41 = vsel %vm58_vm2, %v54_v36, 1326507024  ;;  %v65_v42 = vsel %vm57_vm3, %v48_v34, %v64_v40  ;;  %v59_v21 = vsel %vm55_vm1, %v39_v12, %v42_v32  ;;  %v61_v22 = vsel %vm57_vm3, %v45_v33, %v60_v9 }
  0x8b   :  { %v69_v43 = vsel %vm57_vm3, %v51_v35, %v68_v41  ;;  %v66_v44 = vsel %vm56_vm4, %v63_v38, %v65_v42  ;;  %v62_v13 = vsel %vm56_vm4, %v59_v21, %v61_v22 }
  0x8c   :  { %v70_v45 = vsel %vm56_vm4, %v67_v39, %v69_v43  ;;  %v96_v50 = vand.u32 65535, %v66_v44  ;;  %v97_v51 = vshrl.u32 %v66_v44, 16  ;;  %v116_v29 = vmul.u32 %v447_v37, %v62_v13 }
  0x8d   :  { %v74_v48 = vand.u32 65535, %v70_v45  ;;  %v75_v49 = vshrl.u32 %v70_v45, 16 }
  0x8e   :  { %v99_v54 = vmul.u32 %v97_v51, %v72_v46  ;;  %v100_v55 = vmul.u32 %v96_v50, %v73_v47  ;;  %v98_v59 = vmul.u32 %v96_v50, %v72_v46  ;;  %v101_v63 = vmul.u32 %v97_v51, %v73_v47 }
  0x8f   :  { %v77_v52 = vmul.u32 %v75_v49, %v72_v46  ;;  %v78_v53 = vmul.u32 %v74_v48, %v73_v47  ;;  %v76_v56 = vmul.u32 %v74_v48, %v72_v46  ;;  %v79_v58 = vmul.u32 %v75_v49, %v73_v47 }
  0x90   :  { %v102_v60 = vshll.u32 %v99_v54, 16  ;;  %v104_v2 = vshll.u32 %v100_v55, 16  ;;  %v103_v19 = vshrl.u32 %v99_v54, 16  ;;  %v105_v25 = vshrl.u32 %v100_v55, 16 }
  0x91   :  { %v80_v57 = vshll.u32 %v77_v52, 16  ;;  %v82_v61 = vshll.u32 %v78_v53, 16  ;;  %v81_v14 = vshrl.u32 %v77_v52, 16  ;;  %v83_v23 = vshrl.u32 %v78_v53, 16 }
  0x92   :  { %vm106_vm6 = vc.u32 %v98_v59, %v102_v60  ;;  %v108_v5 = vadd.s32 %v102_v60, %v98_v59 }
  0x93   :  { %vm84_vm5 = vc.u32 %v76_v56, %v80_v57  ;;  %v86_v62 = vadd.s32 %v80_v57, %v76_v56  ;;  %v107_v7 = vsel %vm106_vm6, 1, %v397_v1  ;;  %vm166_vm6 = vweird.f32 %v430_v4 }
  0x94   :  { %v85_v0 = vsel %vm84_vm5, 1, %v397_v1  ;;  %v109_v11 = vadd.s32 %v107_v7, %v101_v63  ;;  %vm110_vm8 = vc.u32 %v108_v5, %v104_v2  ;;  %v112_v28 = vadd.s32 %v108_v5, %v104_v2 }
  0x95   :  { %v87_v6 = vadd.s32 %v85_v0, %v79_v58  ;;  %vm88_vm7 = vc.u32 %v86_v62, %v82_v61  ;;  %v111_v18 = vsel %vm110_vm8, 1, %v397_v1  ;;  %v332_v2 = vlaneseq }
  0x96   :  { %v89_v10 = vsel %vm88_vm7, 1, %v397_v1  ;;  %v113_v20 = vadd.s32 %v111_v18, %v109_v11 }
  0x97   :  { %v91_v17 = vadd.s32 %v89_v10, %v87_v6  ;;  %v333_v8 = vand.u32 127, %v332_v2 }
  0x98   :  { %v114_v26 = vadd.s32 %v113_v20, %v103_v19 }
  0x99   :  { %v92_v24 = vadd.s32 %v91_v17, %v81_v14  ;;  %vm335_vm14 = vcmp.le.s32.totalorder %v333_v8, 16  ;;  %vm334_vm5 = vcmp.eq.s32.totalorder %v333_v8, 0 }
  0x9a   :  { %v115_v16 = vadd.s32 %v114_v26, %v105_v25 }
  0x9b   :  { %v93_v27 = vadd.s32 %v92_v24, %v83_v23 }
  0x9c   :  { %v119_v1 = vadd.s32 1, %v115_v16 }
  0x9d   :  { %vm118_vm9 = vc.u32 %v93_v27, %v112_v28  ;;  %v117_v15 = vadd.s32 %v112_v28, %v93_v27 }
  0x9e   :  { %v120_v30 = vsel %vm118_vm9, %v119_v1, %v115_v16 }
  0x9f   :  { %v121_v31 = vadd.s32 %v120_v30, %v116_v29 }
  0xa1   :  { %v122_v32 = vadd.s32 536870912, %v121_v31 }
  0xa3   :  { %v123_v34 = vshrl.u32 %v122_v32, 30 }
  0xa5   :  { %v124_v35 = vshll.u32 %v123_v34, 30  ;;  %v147_v54 = vsub.s32 4, %v123_v34 }
  0xa7   :  { %v125_v33 = vsub.s32 %v121_v31, %v124_v35  ;;  %v148_v59 = vsel %vm25_vm12, %v147_v54, %v123_v34 }
  0xa8   :  { %v150_v62 = vsel %vm24_vm13, 0, %v148_v59 }
  0xa9   :  { %vm126_vm10 = vcmp.lt.s32.totalorder %v125_v33, 0  ;;  %v127_v36 = vsub.s32 0, %v125_v33  ;;  %v167_v7 = vadd.s32 3, %v150_v62  ;;  %v322_v14 = vand.u32 3, %v150_v62 }
  0xab   :  { %v128_v38 = vsel %vm126_vm10, %v127_v36, %v125_v33  ;;  %v168_v17 = vand.u32 3, %v167_v7  ;;  %vm323_vm15 = vcmp.lt.s32.totalorder %v322_v14, 2  ;;  %vm324_vm0 = vcmp.eq.s32.totalorder %v322_v14, 0 }
  0xac   :  { %v129_v39 = vclz %v128_v38  ;;  %vm327_vm4 = vcmp.eq.s32.totalorder %v322_v14, 2 }
  0xad   :  { %vm169_vm1 = vcmp.lt.s32.totalorder %v168_v17, 2  ;;  %vm170_vm2 = vcmp.eq.s32.totalorder %v168_v17, 0  ;;  %vm173_vm3 = vcmp.eq.s32.totalorder %v168_v17, 2 }
  0xae   :  { %v356_v40 = vadd.s32 4294967294, %v129_v39 }
  0xb0   :  { %vm357_vm11 = vcmp.lt.s32.totalorder %v356_v40, 0 }
  0xb1   :  { %v132_v41 = vsel %vm357_vm11, 0, %v356_v40 }
  0xb2   :  { %v133_v42 = vsub.s32 32, %v132_v41  ;;  %v137_v43 = vsub.s32 4294967266, %v132_v41  ;;  %v134_v44 = vshll.u32 %v125_v33, %v132_v41 }
  0xb4   :  { %v135_v45 = vshrl.u32 %v117_v15, %v133_v42  ;;  %v138_v46 = vadd.s32 127, %v137_v43 }
  0xb6   :  { %v136_v37 = vor.u32 %v135_v45, %v134_v44  ;;  %v139_v47 = vshll.u32 %v138_v46, 23 }
  0xb8   :  { %v140_v48 = vor.u32 4788187, %v139_v47  ;;  %v143_v50 = vcvt.s32.f32 %v136_v37 }
  0xba   :  { %v141_v49 = vand.u32 2147483647, %v140_v48 }
  0xbc   :  { %v144_v51 = vmul.f32 %v143_v50, %v141_v49 }
  0xbe   :  { %v145_v52 = vxor.u32 2147483648, %v144_v51 }
  0xc0   :  { %v146_v53 = vsel %vm25_vm12, %v145_v52, %v144_v51 }
  0xc1   :  { %v149_v55 = vsel %vm24_vm13, %v430_v4, %v146_v53 }
  0xc2   :  { %v151_v56 = vmul.f32 %v149_v55, %v149_v55 }
  0xc4   :  { %v152_v57 = vmul.f32 -0.001358992, %v151_v56  ;;  %v159_v58 = vmul.f32 -0.00019511016, %v151_v56 }
  0xc6   :  { %v153_v60 = vadd.f32 0.041655596, %v152_v57  ;;  %v160_v61 = vadd.f32 0.008332121, %v159_v58 }
  0xc8   :  { %v154_v63 = vmul.f32 %v153_v60, %v151_v56  ;;  %v161_v0 = vmul.f32 %v160_v61, %v151_v56 }
  0xca   :  { %v155_v5 = vadd.f32 -0.4999988, %v154_v63  ;;  %v162_v6 = vadd.f32 -0.16666654, %v161_v0 }
  0xcc   :  { %v156_v9 = vmul.f32 %v155_v5, %v151_v56  ;;  %v163_v10 = vmul.f32 %v162_v6, %v151_v56 }
  0xce   :  { %v157_v11 = vadd.f32 1.0, %v156_v9  ;;  %v164_v12 = vadd.f32 1.0, %v163_v10 }
  0xd0   :  { %v165_v18 = vmul.f32 %v164_v12, %v149_v55  ;;  %v174_v19 = vxor.u32 2147483648, %v157_v11 }
  0xd2   :  { %v171_v20 = vxor.u32 2147483648, %v165_v18  ;;  %v175_v22 = vsel %vm173_vm3, %v174_v19, %v165_v18  ;;  %v329_v24 = vsel %vm327_vm4, %v174_v19, %v165_v18 }
  0xd4   :  { %v172_v21 = vsel %vm170_vm2, %v157_v11, %v171_v20  ;;  %v326_v23 = vsel %vm324_vm0, %v157_v11, %v171_v20 }
  0xd5   :  { %v176_v25 = vsel %vm169_vm1, %v172_v21, %v175_v22  ;;  %v330_v26 = vsel %vm323_vm15, %v326_v23, %v329_v24 }
  0xd6   :  { %v177_v27 = vsel %vm166_vm6, nan, %v176_v25  ;;  %v331_v28 = vsel %vm166_vm6, nan, %v330_v26 }
  0xd7   :  { %v336_v13 = vsel %vm335_vm14, %v177_v27, %v331_v28 }
  0xd8   :  { %v337_v16 = vsel %vm334_vm5, %v427_v3, %v336_v13 }
  0xd9   :  { %338 = vst [vmem:[#allocation2] sm:$0xff] %v337_v16 }
  0xda   :  { %349 = dma.vmem_to_hbm [thread:$0]  %s345_s1, 128, %s347_s15, [#allocation3]  }
  0xdb   :  { %395 = dma.done.wait [#allocation3], 128  }
  0xdc   :  { %396 = vsyncadd [#allocation3], 4294967168 }
  0xdd   :  { %354 = vsyncpa [#allocation3], 1 }

</bundles_post_ra>
